<compile_context>
chip_gen: v6e
topology: v6e:2x2x1
jax: 0.10.0
libtpu: 0.0.40
codegen_flags: <defaults>
</compile_context>

<pallas_src>
import functools
import math
import numpy as np
import jax
import jax.numpy as jnp
from jax import lax
from jax.experimental import pallas as pl
from jax.experimental.pallas import tpu as pltpu


# Safe across v5e/v6e (128 MiB physical) and v7x (64 MiB physical per TC);
# above the 16/32 MiB scoped defaults.
VMEM_LIMIT = 48 * 1024 * 1024


def _pick_tile(dim, target, align):
    """Largest tile <= target that divides dim and is a multiple of align.
    Falls back to the full dim (always legal: block == full array dim).
    TODO(synk): for awkward large dims, pad to a tile multiple instead of
    falling back to a whole-array block."""
    if dim <= target:
        return dim
    t = (target // align) * align
    while t >= align:
        if dim % t == 0:
            return t
        t -= align
    return dim


# ----------------------------------------------------------------------------
# Fused (LayerNorm?) -> matmul -> (+bias, GELU?, +residual?, LayerNorm?) kernel
# ----------------------------------------------------------------------------
def _linear_kernel(*refs, activation, fuse_ln, has_res, has_out_ln, eps, nk):
    it = iter(refs)
    x_ref = next(it)
    w_ref = next(it)
    b_ref = next(it)
    g_ref = next(it) if fuse_ln else None
    gb_ref = next(it) if fuse_ln else None
    res_ref = next(it) if has_res else None
    og_ref = next(it) if has_out_ln else None
    ob_ref = next(it) if has_out_ln else None
    o_ref = next(it)
    acc_ref = next(it) if nk > 1 else None
    xn_ref = next(it) if fuse_ln else None

    j = pl.program_id(1)
    k = pl.program_id(2)

    if fuse_ln:
        # LayerNorm fused into the matmul prologue (tk == K in this path).
        # Normalized rows are cached in VMEM and reused for every N tile j.
        @pl.when(j == 0)
        def _():
            xf = x_ref[...].astype(jnp.float32)
            mu = jnp.mean(xf, axis=-1, keepdims=True)
            xc = xf - mu
            var = jnp.mean(xc * xc, axis=-1, keepdims=True)
            xn = xc * lax.rsqrt(var + eps) * g_ref[...] + gb_ref[...]
            xn_ref[...] = xn.astype(jnp.bfloat16)

        x = xn_ref[...]
    else:
        x = x_ref[...]
        if x.dtype != jnp.bfloat16:
            x = x.astype(jnp.bfloat16)  # in-kernel cast (no extra HBM pass)

    part = jnp.dot(x, w_ref[...], preferred_element_type=jnp.float32)

    def _epilogue(y):
        if activation == "gelu_tanh":
            # TODO(synk): ViTBlock source not provided; tanh-approx GELU assumed.
            c = jnp.float32(0.7978845608028654)
            y = 0.5 * y * (1.0 + jnp.tanh(c * (y + 0.044715 * y * y * y)))
        if has_res:
            y = y + res_ref[...].astype(jnp.float32)
        if has_out_ln:
            # Post-matmul LayerNorm fused into the epilogue (requires tn == N).
            mu = jnp.mean(y, axis=-1, keepdims=True)
            yc = y - mu
            var = jnp.mean(yc * yc, axis=-1, keepdims=True)
            y = yc * lax.rsqrt(var + eps) * og_ref[...] + ob_ref[...]
        return y

    if nk == 1:
        # Single K step: bypass the accumulator scratch entirely.
        o_ref[...] = _epilogue(part + b_ref[...]).astype(o_ref.dtype)
    else:
        @pl.when(k == 0)
        def _():
            acc_ref[...] = jnp.zeros_like(acc_ref)

        acc_ref[...] += part

        @pl.when(k == nk - 1)
        def _():
            o_ref[...] = _epilogue(acc_ref[...] + b_ref[...]).astype(o_ref.dtype)


def linear(x, w, b, *, activation="none", residual=None, ln=None, out_ln=None,
           eps=1e-6, out_dtype=jnp.float32):
    """y = outLN?(act(LN?(x) @ w + b) + residual?)   (f32 acc, bf16 MXU inputs)."""
    M, K = x.shape
    Kw, N = w.shape
    assert K == Kw
    fuse_ln = ln is not None
    has_res = residual is not None
    has_out_ln = out_ln is not None

    w = w.astype(jnp.bfloat16)

    tm = _pick_tile(M, 512, 16)              # 16-row align: bf16 packs 2 rows/sublane
    tn = N if has_out_ln else _pick_tile(N, 512, 128)
    tk = K if fuse_ln else _pick_tile(K, 1024, 128)   # LN fusion needs full K
    nk = K // tk
    grid = (M // tm, N // tn, nk)

    in_specs = [
        pl.BlockSpec((tm, tk), lambda i, j, k: (i, k)),
        pl.BlockSpec((tk, tn), lambda i, j, k: (k, j)),
        pl.BlockSpec((1, tn), lambda i, j, k: (0, j)),
    ]
    inputs = [x, w, b.reshape(1, N).astype(jnp.float32)]
    if fuse_ln:
        g, gb = ln
        in_specs += [pl.BlockSpec((1, tk), lambda i, j, k: (0, k)),
                     pl.BlockSpec((1, tk), lambda i, j, k: (0, k))]
        inputs += [g.reshape(1, K).astype(jnp.float32),
                   gb.reshape(1, K).astype(jnp.float32)]
    if has_res:
        in_specs.append(pl.BlockSpec((tm, tn), lambda i, j, k: (i, j)))
        inputs.append(residual)
    if has_out_ln:
        og, ob = out_ln
        in_specs += [pl.BlockSpec((1, tn), lambda i, j, k: (0, j)),
                     pl.BlockSpec((1, tn), lambda i, j, k: (0, j))]
        inputs += [og.reshape(1, N).astype(jnp.float32),
                   ob.reshape(1, N).astype(jnp.float32)]

    scratch = []
    if nk > 1:
        scratch.append(pltpu.VMEM((tm, tn), jnp.float32))
    if fuse_ln:
        scratch.append(pltpu.VMEM((tm, tk), jnp.bfloat16))

    # With the LN cache guarded on j == 0, megacore must only shard the i axis.
    if fuse_ln:
        dims = ("parallel", "arbitrary", "arbitrary")
    else:
        dims = ("parallel", "parallel", "arbitrary")

    out_size = jnp.dtype(out_dtype).itemsize
    bytes_accessed = int(x.size * x.dtype.itemsize + w.size * w.dtype.itemsize
                         + M * N * out_size + (M * N * 4 if has_res else 0))
    return pl.pallas_call(
        functools.partial(_linear_kernel, activation=activation,
                          fuse_ln=fuse_ln, has_res=has_res,
                          has_out_ln=has_out_ln, eps=eps, nk=nk),
        grid=grid,
        in_specs=in_specs,
        out_specs=pl.BlockSpec((tm, tn), lambda i, j, k: (i, j)),
        out_shape=jax.ShapeDtypeStruct((M, N), out_dtype),
        scratch_shapes=scratch,
        compiler_params=pltpu.CompilerParams(
            dimension_semantics=dims, vmem_limit_bytes=VMEM_LIMIT),
        cost_estimate=pl.CostEstimate(
            flops=2 * M * N * K,
            transcendentals=(M * N if activation != "none" else 0),
            bytes_accessed=bytes_accessed),
    )(*inputs)


# ----------------------------------------------------------------------------
# Attention: consumes packed bf16 qkv (B, T, 3D), writes bf16 (B, T, D)
# ----------------------------------------------------------------------------
def _attn_kernel(qkv_ref, o_ref, *, num_heads, scale):
    threeD = qkv_ref.shape[2]
    D = threeD // 3
    Dh = D // num_heads
    for h in range(num_heads):                 # static slices -> free ref views
        qh = qkv_ref[0, :, h * Dh:(h + 1) * Dh] * scale          # scale folded into q
        kh = qkv_ref[0, :, D + h * Dh:D + (h + 1) * Dh]
        vh = qkv_ref[0, :, 2 * D + h * Dh:2 * D + (h + 1) * Dh]
        s = lax.dot_general(qh, kh, (((1,), (1,)), ((), ())),
                            preferred_element_type=jnp.float32)   # (T, T) f32
        m = jnp.max(s, axis=-1, keepdims=True)
        p = jnp.exp(s - m)
        denom = jnp.sum(p, axis=-1, keepdims=True)
        p = p * pl.reciprocal(denom, approx=True)                 # EUP, not VPU divide
        oh = jnp.dot(p.astype(jnp.bfloat16), vh,
                     preferred_element_type=jnp.float32)          # (T, Dh)
        o_ref[0, :, h * Dh:(h + 1) * Dh] = oh.astype(o_ref.dtype)
    # HBM writeback is a single lane-dense (T, D) slab per batch element.


def attention(qkv_btd, num_heads):
    # TODO(synk): for long T (v7x 64 MiB VMEM) switch to an online-softmax
    # (flash) loop tiled over KV and shard heads across the grid.
    B, T, threeD = qkv_btd.shape
    D = threeD // 3
    Dh = D // num_heads
    scale = 1.0 / math.sqrt(Dh)
    return pl.pallas_call(
        functools.partial(_attn_kernel, num_heads=num_heads, scale=scale),
        grid=(B,),
        in_specs=[pl.BlockSpec((1, T, threeD), lambda b: (b, 0, 0))],
        out_specs=pl.BlockSpec((1, T, D), lambda b: (b, 0, 0)),
        out_shape=jax.ShapeDtypeStruct((B, T, D), jnp.bfloat16),
        compiler_params=pltpu.CompilerParams(
            dimension_semantics=("parallel",), vmem_limit_bytes=VMEM_LIMIT),
    )(qkv_btd)


# ----------------------------------------------------------------------------
# Vector quantization: row-tiled nearest-code lookup (+ fused commit-loss sum)
# ----------------------------------------------------------------------------
def _vq_kernel(z_ref, cb_ref, zq_ref, idx_ref, cnt_ref, sse_ref):
    z = z_ref[...]                                         # (tm, Dc) f32
    e = cb_ref[...]                                        # (n_e, Dc) f32
    n_e = e.shape[0]
    z2 = jnp.sum(z * z, axis=-1, keepdims=True)            # (tm, 1)
    e2 = jnp.sum(e * e, axis=-1)[None, :]                  # (1, n_e)
    # f32 cross term so argmin matches the f32 reference (review concern).
    cross = lax.dot_general(z, e, (((1,), (1,)), ((), ())),
                            preferred_element_type=jnp.float32)      # (tm, n_e)
    dist = z2 - 2.0 * cross + e2
    mind = jnp.min(dist, axis=-1, keepdims=True)
    iota = lax.broadcasted_iota(jnp.int32, dist.shape, 1)
    idx = jnp.min(jnp.where(dist == mind, iota, n_e), axis=-1)        # first argmin
    onehot = (iota == idx[:, None]).astype(jnp.float32)               # VMEM only
    zq = jnp.dot(onehot, e, preferred_element_type=jnp.float32)
    zq_ref[...] = zq
    idx_ref[...] = idx[None, :].astype(jnp.int32)                     # (1, tm) lane-dense
    cnt_ref[...] = jnp.sum(onehot, axis=0, keepdims=True)[None]       # (1, 1, n_e)
    diff = zq - z
    sse_ref[...] = jnp.sum(diff * diff).reshape(1, 1, 1)              # commit partial


def vq_lookup(z, codebook):
    # TODO(synk): for very large codebooks (n_e >= 4096) tile over n_e with a
    # running (min-dist, argmin) pair instead of the full (tm, n_e) distance.
    M, Dc = z.shape
    n_e = codebook.shape[0]
    tm = _pick_tile(M, 512, 128)
    nt = M // tm
    zq, idx, counts, sse = pl.pallas_call(
        _vq_kernel,
        grid=(nt,),
        in_specs=[pl.BlockSpec((tm, Dc), lambda i: (i, 0)),
                  pl.BlockSpec((n_e, Dc), lambda i: (0, 0))],
        out_specs=(pl.BlockSpec((tm, Dc), lambda i: (i, 0)),
                   pl.BlockSpec((1, tm), lambda i: (0, i)),
                   pl.BlockSpec((1, 1, n_e), lambda i: (i, 0, 0)),
                   pl.BlockSpec((1, 1, 1), lambda i: (i, 0, 0))),
        out_shape=(jax.ShapeDtypeStruct((M, Dc), jnp.float32),
                   jax.ShapeDtypeStruct((1, M), jnp.int32),
                   jax.ShapeDtypeStruct((nt, 1, n_e), jnp.float32),
                   jax.ShapeDtypeStruct((nt, 1, 1), jnp.float32)),
        compiler_params=pltpu.CompilerParams(
            dimension_semantics=("parallel",), vmem_limit_bytes=VMEM_LIMIT),
    )(z, codebook)
    return zq, idx[0], counts, sse


# ----------------------------------------------------------------------------
# Model glue (plain JAX around the kernels)
# ----------------------------------------------------------------------------
def get_2d_sincos_pos_embed(embed_dim, grid_size):
    def _1d(dim, pos):
        omega = np.arange(dim // 2, dtype=np.float64)
        omega /= dim / 2.0
        omega = 1.0 / 10000 ** omega
        pos = pos.reshape(-1)
        out = np.einsum("m,d->md", pos, omega)
        return np.concatenate([np.sin(out), np.cos(out)], axis=1)

    grid_h = np.arange(grid_size, dtype=np.float32)
    grid_w = np.arange(grid_size, dtype=np.float32)
    grid = np.meshgrid(grid_w, grid_h)  # w first
    grid = np.stack(grid, axis=0).reshape([2, 1, grid_size, grid_size])
    emb_h = _1d(embed_dim // 2, grid[0])
    emb_w = _1d(embed_dim // 2, grid[1])
    return np.concatenate([emb_h, emb_w], axis=1).astype(np.float32)  # (T, D)


def patch_embed(x_nchw, w, b, p):
    N, C, H, W = x_nchw.shape
    gh, gw = H // p, W // p
    xp = x_nchw.reshape(N, C, gh, p, gw, p)
    xp = jnp.transpose(xp, (0, 2, 4, 1, 3, 5))          # (N, gh, gw, C, p, p)
    xp = xp.reshape(N * gh * gw, C * p * p)
    y = linear(xp, w, b)                                 # tiled Pallas matmul (f32 out)
    return y.reshape(N, gh * gw, -1)


def vit_block(x2, prm, num_heads, B, T):
    # TODO(synk): ViTBlock internals not in the provided source; assumes a
    # timm-style pre-LN block (LN->qkv->attn->proj (+res), LN->fc1->GELU->fc2 (+res)).
    D = x2.shape[-1]
    # attention branch: LN fused into qkv matmul prologue; qkv / attn are bf16
    qkv = linear(x2, prm["qkv_w"], prm["qkv_b"],
                 ln=(prm["ln1_g"], prm["ln1_b"]), out_dtype=jnp.bfloat16)
    attn_out = attention(qkv.reshape(B, T, 3 * D), num_heads)          # (B, T, D) bf16
    x2 = linear(attn_out.reshape(B * T, D), prm["proj_w"], prm["proj_b"],
                residual=x2)                                            # f32 residual stream
    # MLP branch: LN fused into fc1 prologue, GELU in fc1 epilogue, residual in fc2
    h = linear(x2, prm["fc1_w"], prm["fc1_b"], activation="gelu_tanh",
               ln=(prm["ln2_g"], prm["ln2_b"]), out_dtype=jnp.bfloat16)
    x2 = linear(h, prm["fc2_w"], prm["fc2_b"], residual=x2)
    return x2


def quantizer_forward(prm, x, post_ln):
    # TODO(synk): construct_quantizer is external to the provided source; this
    # implements a standard VQ (in_proj -> nearest code -> out_proj) with a
    # commitment-style loss; exact quantizer internals may differ.
    B, L, D = x.shape
    z = linear(x.reshape(B * L, D), prm["in_w"], prm["in_b"])     # f32 (VQ precision)
    zq, idx, counts, sse = vq_lookup(z, prm["codebook"])
    # out-projection with the final LayerNorm (ln3) fused into its epilogue
    out = linear(zq, prm["out_w"], prm["out_b"], out_ln=post_ln)  # (B*L, enc_hidden)
    commit = sse.sum() / (z.shape[0] * z.shape[1])
    loss = commit * (1.0 + 0.25)
    avg_probs = counts.reshape(-1, counts.shape[-1]).sum(axis=0) / (B * L)
    perplexity = jnp.exp(-jnp.sum(avg_probs * jnp.log(avg_probs + 1e-10)))
    log_dict = {"perplexity": perplexity}
    return out.reshape(B, L, -1), idx.reshape(B, L), loss, log_dict


def encoder_forward(params, cfg, x, d):
    p = cfg["patch_size"]
    K, depth, num_heads = cfg["K"], cfg["depth"], cfg["num_heads"]

    # PatchEmbed + fixed sincos pos-embed
    tokens = patch_embed(x, params["pe_w"], params["pe_b"], p) + params["pos_embed"]
    B, T, D = tokens.shape
    h2 = tokens.reshape(B * T, D)

    # encoder blocks, keep outputs of the last K blocks, concat on seq dim
    outs = []
    for i in range(depth):
        h2 = vit_block(h2, params["blocks"][i], num_heads, B, T)
        if i >= depth - K:
            outs.append(h2.reshape(B, T, D))
    outs = jnp.concatenate(outs, axis=1)                 # (B, K*T, D)

    # pre_norm=False, apply_losses_together=False (module defaults)
    to_quantizer_features = outs
    # post_norm=True -> final_layer_norm3 is fused into the quantizer out-proj
    outs_q, indices, loss, log_dict = quantizer_forward(
        params["quantizer"], to_quantizer_features,
        post_ln=(params["ln3_g"], params["ln3_b"]))
    log_dict.update({"perplexity_list": [log_dict["perplexity"]],
                     "deter_list": [0.0]})
    # TODO(synk): get_perplexity_list uses quantizer._codebook.timestep_p_over_c
    # (quantizer-internal state); perplexity above is computed from assignments.

    # get_encoder_mask: block index per token (arange(K).repeat_interleave(T)),
    # broadcast over batch, compared to d.
    block_idx = jnp.repeat(jnp.arange(K, dtype=jnp.int32), T)        # (K*T,)
    enc_mask = block_idx[None, :] <= d[:, None]                      # (B, K*T) bool
    attn_mask = enc_mask
    encoder_hidden_states = outs_q * enc_mask[..., None].astype(outs_q.dtype)

    return (encoder_hidden_states, to_quantizer_features, outs_q,
            attn_mask, loss, log_dict, indices)


# ----------------------------------------------------------------------------
# Deterministic parameter initialization (matmul weights stored in bf16)
# ----------------------------------------------------------------------------
def xavier_uniform(key, fan_in, fan_out, dtype=jnp.bfloat16):
    limit = float(np.sqrt(6.0 / (fan_in + fan_out)))
    w = jax.random.uniform(key, (fan_in, fan_out), jnp.float32, -limit, limit)
    return w.astype(dtype)


def init_params(key, cfg):
    D = cfg["hidden_size"]
    p = cfg["patch_size"]
    C = cfg["in_channels"]
    mlp_hidden = int(D * cfg["mlp_ratio"])
    enc_hidden = cfg["encoder_hidden_size"]
    code_dim = cfg["code_dim"]
    n_e = cfg["codebook_size"]
    T = (cfg["input_size"] // p) ** 2

    keys = iter(jax.random.split(key, 8 * cfg["depth"] + 16))
    params = {
        "pe_w": xavier_uniform(next(keys), C * p * p, D),
        "pe_b": jnp.zeros((D,), jnp.float32),
        "pos_embed": jnp.asarray(get_2d_sincos_pos_embed(D, int(np.sqrt(T))))[None],
        "ln3_g": jnp.ones((enc_hidden,), jnp.float32),
        "ln3_b": jnp.zeros((enc_hidden,), jnp.float32),
        "blocks": [],
        "quantizer": {
            "in_w": xavier_uniform(next(keys), D, code_dim),
            "in_b": jnp.zeros((code_dim,), jnp.float32),
            "codebook": jax.random.uniform(next(keys), (n_e, code_dim),
                                           jnp.float32, -1.0 / n_e, 1.0 / n_e),
            "out_w": xavier_uniform(next(keys), code_dim, enc_hidden),
            "out_b": jnp.zeros((enc_hidden,), jnp.float32),
        },
    }
    for _ in range(cfg["depth"]):
        params["blocks"].append({
            "ln1_g": jnp.ones((D,), jnp.float32),
            "ln1_b": jnp.zeros((D,), jnp.float32),
            "qkv_w": xavier_uniform(next(keys), D, 3 * D),
            "qkv_b": jnp.zeros((3 * D,), jnp.float32),
            "proj_w": xavier_uniform(next(keys), D, D),
            "proj_b": jnp.zeros((D,), jnp.float32),
            "ln2_g": jnp.ones((D,), jnp.float32),
            "ln2_b": jnp.zeros((D,), jnp.float32),
            "fc1_w": xavier_uniform(next(keys), D, mlp_hidden),
            "fc1_b": jnp.zeros((mlp_hidden,), jnp.float32),
            "fc2_w": xavier_uniform(next(keys), mlp_hidden, D),
            "fc2_b": jnp.zeros((D,), jnp.float32),
        })
    return params


# ----------------------------------------------------------------------------
if __name__ == "__main__":
    cfg = dict(
        K=2, depth=2, input_size=16, patch_size=8, in_channels=4,
        hidden_size=32, encoder_hidden_size=32, num_heads=4, mlp_ratio=4.0,
        codebook_size=16, code_dim=8,
    )
    key = jax.random.PRNGKey(0)
    kp, kx = jax.random.split(key)
    params = init_params(kp, cfg)

    x = jax.random.normal(kx, (2, cfg["in_channels"], 16, 16), jnp.float32)
    d = jnp.array([0, 1], dtype=jnp.int32)

    outs = encoder_forward(params, cfg, x, d)
    jax.block_until_ready(outs[0])
    jax.block_until_ready(outs[2])
    jax.block_until_ready(outs[4])
    jax.block_until_ready(outs[6])
    print("KERNEL_OK")
</pallas_src>

<mosaic_0001>
module attributes {stable_mosaic.version = 11 : i64} {
  func.func @_linear_kernel(%arg0: i32, %arg1: i32, %arg2: i32, %arg3: memref<8x256xf32, #tpu.memory_space<vmem>>, %arg4: memref<256x32xbf16, #tpu.memory_space<vmem>>, %arg5: memref<1x32xf32, #tpu.memory_space<vmem>>, %arg6: memref<8x32xf32, #tpu.memory_space<vmem>>) attributes {dimension_semantics = [#tpu.dimension_semantics<parallel>, #tpu.dimension_semantics<parallel>, #tpu.dimension_semantics<arbitrary>], iteration_bounds = array<i64: 1, 1, 1>, scalar_prefetch = 0 : i64, scratch_operands = 0 : i64, tpu.core_type = #tpu.core_type<tc>, window_params = [{transform_indices = @transform_0, window_bounds = array<i64: 8, 256>}, {transform_indices = @transform_1, window_bounds = array<i64: 256, 32>}, {transform_indices = @transform_2, window_bounds = array<i64: 1, 32>}, {transform_indices = @transform_3, window_bounds = array<i64: 8, 32>}]} {
    %c0 = arith.constant 0 : index
    %c0_0 = arith.constant 0 : index
    %0 = vector.load %arg3[%c0, %c0_0] : memref<8x256xf32, #tpu.memory_space<vmem>>, vector<8x256xf32>
    %1 = arith.truncf %0 : vector<8x256xf32> to vector<8x256xbf16>
    %c0_1 = arith.constant 0 : index
    %c0_2 = arith.constant 0 : index
    %2 = vector.load %arg4[%c0_1, %c0_2] : memref<256x32xbf16, #tpu.memory_space<vmem>>, vector<256x32xbf16>
    %cst = arith.constant dense<0.000000e+00> : vector<8x32xf32>
    %3 = tpu.matmul %1, %2, %cst {dimension_numbers = #tpu.dot_dimension_numbers<[1], [0], [0], [1], [0, 0, 1, 1], [], []>} : vector<8x256xbf16>, vector<256x32xbf16>, vector<8x32xf32> -> vector<8x32xf32>
    %c0_3 = arith.constant 0 : index
    %c0_4 = arith.constant 0 : index
    %4 = vector.load %arg5[%c0_3, %c0_4] : memref<1x32xf32, #tpu.memory_space<vmem>>, vector<1x32xf32>
    %5 = vector.broadcast %4 : vector<1x32xf32> to vector<8x32xf32>
    %6 = arith.addf %3, %5 : vector<8x32xf32>
    %c0_5 = arith.constant 0 : index
    %c0_6 = arith.constant 0 : index
    %7 = vector.load %arg6[%c0_5, %c0_6] : memref<8x32xf32, #tpu.memory_space<vmem>>, vector<8x32xf32>
    tpu.vector_store %arg6[%c0_5, %c0_6], %6 {strides = array<i32>} : memref<8x32xf32, #tpu.memory_space<vmem>>, vector<8x32xf32>,
    return
  }
  func.func @transform_0(%arg0: i32, %arg1: i32, %arg2: i32) -> (i32, i32) {
    %c0_i32 = arith.constant 0 : i32
    return %arg0, %arg2 : i32, i32
  }
  func.func @transform_1(%arg0: i32, %arg1: i32, %arg2: i32) -> (i32, i32) {
    %c0_i32 = arith.constant 0 : i32
    return %arg2, %arg1 : i32, i32
  }
  func.func @transform_2(%arg0: i32, %arg1: i32, %arg2: i32) -> (i32, i32) {
    %c0_i32 = arith.constant 0 : i32
    %c0_i32_0 = arith.constant 0 : i32
    return %c0_i32, %arg1 : i32, i32
  }
  func.func @transform_3(%arg0: i32, %arg1: i32, %arg2: i32) -> (i32, i32) {
    %c0_i32 = arith.constant 0 : i32
    return %arg0, %arg1 : i32, i32
  }
}

</mosaic_0001>

<bundles_post_ra>
// kernel: tpu_custom_call.1
= control target key start
LH: loop header
LB: loop body
LE: loop exit
PB: predicated region body
PF: predicated region fallthrough
CT: control target
= control target key end

     0   :  { %s370_s0 = inlined_call_operand.vmem [shape: f32[8,256], index: 0, kind: input, shape index: {}]   ;;  %s371_s1 = inlined_call_operand.vmem [shape: bf16[256,32], index: 1, kind: input, shape index: {}]   ;;  %s372_s2 = inlined_call_operand.vmem [shape: f32[1,32], index: 2, kind: input, shape index: {}]   ;;  %s373_s3 = inlined_call_operand.hbm [shape: f32[8,32], index: 3, kind: output, shape index: {}]  }
   0x1   :  { %v251_v0 = vld [vmem:[%s371_s1 + $0x78] sm:$0xff]   ;;  %v253_v2 = vld [vmem:[%s371_s1 + $0x70] sm:$0xff]   ;;  %v255_v4 = vld [vmem:[%s371_s1 + $0x68] sm:$0xff]  }
   0x2   :  { %v252_v1 = vld [vmem:[%s371_s1 + $0x38] sm:$0xff]   ;;  %228 = vmatprep.subr.bf16.mxu0 %v251_v0  ;;  %v254_v3 = vld [vmem:[%s371_s1 + $0x30] sm:$0xff]   ;;  %v256_v5 = vld [vmem:[%s371_s1 + $0x28] sm:$0xff]  }
   0x3   :  { %229 = vmatpush3.bf16.msra.mxu0 %v252_v1  ;;  %v257_v6 = vld [vmem:[%s371_s1 + $0x60] sm:$0xff]   ;;  %v259_v8 = vld [vmem:[%s371_s1 + $0x58] sm:$0xff]   ;;  %v261_v10 = vld [vmem:[%s371_s1 + $0x50] sm:$0xff]  }
   0x4   :  { %230 = vmatprep.subr.bf16.mxu0 %v253_v2  ;;  %v258_v7 = vld [vmem:[%s371_s1 + $0x20] sm:$0xff]   ;;  %v260_v9 = vld [vmem:[%s371_s1 + $0x18] sm:$0xff]   ;;  %v17_v11 = vld [vmem:[%s370_s0 + $0x8] sm:$0xff] }
   0x7   :  { %231 = vmatpush3.bf16.msra.mxu0 %v254_v3 }
   0x8   :  { %232 = vmatprep.subr.bf16.mxu0 %v255_v4 }
   0xb   :  { %233 = vmatpush3.bf16.msra.mxu0 %v256_v5 }
   0xc   :  { %234 = vmatprep.subr.bf16.mxu0 %v257_v6 }
   0xf   :  { %235 = vmatpush3.bf16.msra.mxu0 %v258_v7 }
  0x10   :  { %236 = vmatprep.subr.bf16.mxu0 %v259_v8 }
  0x11   :  { %8 = vsyncpa [#allocation3], 0  ;;  %v19_v12 = vpack.c.bf16 %v17_v11, %v17_v11  ;;  %v262_v13 = vld [vmem:[%s371_s1 + $0x10] sm:$0xff]   ;;  %v263_v14 = vld [vmem:[%s371_s1 + $0x48] sm:$0xff]   ;;  %s289_s23 = smov [#allocation2]   ;;  %vm195_vm0 = vcmask 261120  }
  0x12   :  { %v264_v15 = vld [vmem:[%s371_s1 + $0x8] sm:$0xff]   ;;  %v265_v16 = vld [vmem:[%s371_s1 + $0x40] sm:$0xff]   ;;  %s203_s24 = sshll.u32 %s289_s23, 4  ;;  %s204_s24 = int_to_ptr.vmem [resolvable:$true] %s203_s24 }
  0x13   :  { %237 = vmatpush3.bf16.msra.mxu0 %v260_v9  ;;  %187 = vmatprep.mubr.bf16.mxu0 %v19_v12  ;;  %v266_v17 = vld [vmem:[%s371_s1] sm:$0xff]   ;;  %p272_p1 = scmp.lt.s32.totalorder %s204_s24, %s204_s24 }
  0x14   :  { %238 = vmatprep.subr.bf16.mxu0 %v261_v10  ;;  %v16_v18 = vld [vmem:[%s370_s0] sm:$0xff]  ;;  %s267_s0 = scalar_lea.vmem %s204_s24, 128 }
  0x15   :  { %v18_v19 = vpack.c.bf16 %v16_v18, %v16_v18  ;;  %v211_v21 = vld [vmem:[%s372_s2] ss:$0 sm:$0xff]  ;;  %p268_p0 = scmp.ne.s32.totalorder %s204_s24, %s267_s0  ;;  %p273_p2 = scmp.lt.s32.totalorder %s267_s0, %s267_s0 }
  0x17   :  { %239 = vmatpush3.bf16.msra.mxu0 %v262_v13  ;;  %p274_p3 = por %p273_p2, %p272_p1 }
  0x18   :  { %240 = vmatprep.subr.bf16.mxu0 %v263_v14 }
  0x19   :  { %p275_p4 = pnand %p274_p3, %p268_p0 }
  0x1b   :  { %241 = vmatpush3.bf16.msra.mxu0 %v264_v15 }
  0x1c   :  { %242 = vmatprep.subr.bf16.mxu0 %v265_v16 }
  0x1f   :  { %243 = vmatpush3.bf16.msra.mxu0 %v266_v17 }
  0x22   :  { %188 = vmatmul.mubr.bf16.vlgmr.msra.gmra.mxu0 %v18_v19 }
  0xe2   :  { %v244_v20 = vpop.f32.mrf.mxu0 }
  0xe4   :  { %v245_v22 = vpop.f32.mrf.mxu0 }
  0xe5   :  { %v246_v23 = vadd.f32 %v245_v22, %v244_v20 }
  0xe6   :  { %v247_v24 = vpop.f32.mrf.mxu0 }
  0xe7   :  { %v190_v25 = vadd.f32 %v246_v23, %v211_v21 }
  0xe8   :  { %v248_v26 = vpop.f32.mrf.mxu0 }
  0xe9   :  { %196 = vst.msk [vmem:[#allocation2] sm:$0xff] %vm195_vm0, %v190_v25 }
  0xea   :  { %278 = shalt.err (!%p275_p4)
}
  0xeb   :  { %206 = dma.vmem_to_hbm [thread:$0]  %s204_s24, 128, %s373_s3, [#allocation3]  }
  0xec   :  { %287 = dma.done.wait [#allocation3], 128  }
  0xed   :  { %288 = vsyncadd [#allocation3], 4294967168 }
  0xee   :  { %210 = vsyncpa [#allocation3], 1 }

</bundles_post_ra>
